<compile_context>
chip_gen: v7x
topology: tpu7x:2x2x1
jax: 0.10.0
libtpu: 0.0.40
codegen_flags: <defaults>
</compile_context>

<pallas_src>
import functools

import numpy as np

import jax
import jax.numpy as jnp
from jax import lax
from jax.experimental import pallas as pl
from jax.experimental.pallas import tpu as pltpu


# --------------------------------------------------------------------------
# N-D path kernel: spatial positions lane/sublane dense, classes unrolled.
# --------------------------------------------------------------------------
def _focal_loss_nd_kernel(x_ref, t_ref, o_ref, *, gamma, num_classes, hw_valid,
                          tile_rows, need_mask, alpha_consts):
    """One (n, hw-tile) grid step.

    x_ref: (1, C, ls, 128) logits tile (input dtype)
    t_ref: (1, ls, 128)    int32 target class per position
    o_ref: (1, 1, 1, 128)  f32 per-lane partial loss sums for this tile
    """
    C = num_classes
    ls = tile_rows
    has_alpha = alpha_consts is not None
    t = t_ref[0]                                       # (ls, 128) int32

    # max over classes in the INPUT dtype (exact for bf16); cast to f32 once.
    m = x_ref[0, 0]
    for c in range(1, C):
        m = jnp.maximum(m, x_ref[0, c])
    m = m.astype(jnp.float32)

    sexp = None
    zt = None
    at = None
    for c in range(C):
        zc = x_ref[0, c].astype(jnp.float32) - m       # single f32 cast per class
        ec = jnp.exp(zc)
        sel = t == c
        if c == 0:
            sexp = ec
            zt = jnp.where(sel, zc, 0.0)
            if has_alpha:
                at = jnp.where(sel, alpha_consts[0], 0.0)
        else:
            sexp = sexp + ec
            zt = jnp.where(sel, zc, zt)
            if has_alpha:
                at = jnp.where(sel, alpha_consts[c], at)

    logpt = zt - jnp.log(sexp)                         # log p_target, (ls, 128)
    logpt_w = logpt * at if has_alpha else logpt

    g = float(gamma)
    if g == 0.0:                                       # trace-time specialization
        loss = -logpt_w                                # pt never computed
    else:
        pt = jnp.exp(logpt)                            # un-scaled pt (matches ref)
        omp = 1.0 - pt
        if g == float(int(g)) and 1.0 <= g <= 8.0:
            mod = omp
            for _ in range(int(g) - 1):                # multiply chain, no exp/log
                mod = mod * omp
        else:
            mod = jnp.power(omp, g)                    # generic non-integer gamma
        loss = -(mod * logpt_w)

    def _write(l):
        o_ref[...] = jnp.sum(l, axis=0, keepdims=True).reshape(o_ref.shape)

    if need_mask:
        # Only the LAST hw tile contains lane padding / sublane overrun garbage;
        # gate the mask arithmetic to that tile.
        j = pl.program_id(1)
        last = pl.num_programs(1) - 1

        @pl.when(j == last)
        def _():
            row = j * ls + lax.broadcasted_iota(jnp.int32, (ls, 128), 0)
            col = lax.broadcasted_iota(jnp.int32, (ls, 128), 1)
            valid = (row * 128 + col) < hw_valid
            _write(jnp.where(valid, loss, 0.0))

        @pl.when(j != last)
        def _():
            _write(loss)
    else:
        _write(loss)


# --------------------------------------------------------------------------
# 2D (M, C) classification kernel: classes on the lane axis, no HBM transpose.
# --------------------------------------------------------------------------
def _focal_loss_2d_kernel(x_ref, t_ref, o_ref, *, gamma, num_classes, alpha_consts):
    """x_ref: (tm, C) logits; t_ref: (tm, 1) int32; o_ref: (tm, 1) f32 per-row loss."""
    C = num_classes
    x = x_ref[...].astype(jnp.float32)                 # (tm, C)
    t = t_ref[...]                                     # (tm, 1)

    m = jnp.max(x, axis=-1, keepdims=True)             # lane (XLU) reductions
    z = x - m
    s = jnp.sum(jnp.exp(z), axis=-1, keepdims=True)
    cls = lax.broadcasted_iota(jnp.int32, x.shape, 1)
    sel = cls == t                                     # one-hot target select
    zt = jnp.sum(jnp.where(sel, z, 0.0), axis=-1, keepdims=True)
    logpt = zt - jnp.log(s)                            # (tm, 1)

    logpt_w = logpt
    if alpha_consts is not None:
        at = jnp.where(t == 0, alpha_consts[0], 0.0)
        for c in range(1, C):
            at = jnp.where(t == c, alpha_consts[c], at)
        logpt_w = logpt * at

    g = float(gamma)
    if g == 0.0:
        loss = -logpt_w
    else:
        pt = jnp.exp(logpt)
        omp = 1.0 - pt
        if g == float(int(g)) and 1.0 <= g <= 8.0:
            mod = omp
            for _ in range(int(g) - 1):
                mod = mod * omp
        else:
            mod = jnp.power(omp, g)
        loss = -(mod * logpt_w)

    # Per-row loss; Pallas clips the out-of-bounds rows of a ragged last block,
    # so no in-kernel row mask is required.
    o_ref[...] = loss.astype(o_ref.dtype)


# --------------------------------------------------------------------------
# Wrappers
# --------------------------------------------------------------------------
def _round_up(v, m):
    return -(-v // m) * m


def _alpha_constants(alpha, num_classes):
    """Mirror FocalLoss.__init__ alpha handling as trace-time constants."""
    if alpha is None:
        return None
    if isinstance(alpha, (float, int)) and not isinstance(alpha, bool):
        # PyTorch builds a length-2 tensor [alpha, 1-alpha]; classes >= 2 would
        # index OOB in the reference — here they get alpha = 0 (documented).
        av = np.array([float(alpha), 1.0 - float(alpha)], np.float64)
    else:
        av = np.asarray(alpha, np.float64).reshape(-1)   # list / tuple / ndarray
    out = np.zeros((num_classes,), np.float64)
    k = min(av.shape[0], num_classes)
    out[:k] = av[:k]
    return tuple(float(v) for v in out)


def _focal_loss_nd_pallas(x, target, *, gamma, alpha_consts, size_average,
                          block_bytes):
    N, C = x.shape[0], x.shape[1]
    HW = int(np.prod(x.shape[2:]))
    in_dtype = x.dtype

    x3 = x.reshape(N, C, HW)                           # free reshape (contiguous)
    t2 = jnp.asarray(target).reshape(N, HW).astype(jnp.int32)

    HWp = _round_up(HW, 128)
    if HWp != HW:
        # TODO(synk): this pad is a full extra HBM pass; only hit when the
        # spatial extent is not 128-aligned.
        x3 = jnp.pad(x3, ((0, 0), (0, 0), (0, HWp - HW)))
        t2 = jnp.pad(t2, ((0, 0), (0, HWp - HW)))
    HW128 = HWp // 128

    x4 = x3.reshape(N, C, HW128, 128)                  # free reshape
    t3 = t2.reshape(N, HW128, 128)

    # --- tile sizing ---
    itemsize = jnp.dtype(in_dtype).itemsize
    sub = max(8, 32 // itemsize)                       # dtype sublane multiple
    ls_blk = block_bytes // (C * 128 * itemsize)       # from logits-block budget
    # f32 temporaries (~10 planes) + double-buffered inputs, v7x-safe budget
    bytes_per_row = 128 * (2 * C * itemsize + 2 * 4 + 10 * 4)
    ls_vmem = (40 << 20) // bytes_per_row
    ls = max(sub, (min(ls_blk, ls_vmem) // sub) * sub)
    if ls >= HW128:
        ls = HW128                                     # full dim is always legal
    num_tiles = -(-HW128 // ls)
    need_mask = (num_tiles * ls * 128) != HW           # lane pad + sublane overrun

    tile_bytes = (2 * C * ls * 128 * itemsize          # double-buffered logits
                  + 2 * ls * 128 * 4                   # double-buffered targets
                  + 10 * ls * 128 * 4                  # f32 temporaries
                  + 2 * 128 * 4)                       # output block
    # explicit limit: above v5e's 16 MiB scoped default, below v7x's 64 MiB.
    vmem_limit = int(min(48 << 20, max(32 << 20, tile_bytes + (4 << 20))))

    kernel = functools.partial(
        _focal_loss_nd_kernel, gamma=float(gamma), num_classes=C, hw_valid=HW,
        tile_rows=ls, need_mask=need_mask, alpha_consts=alpha_consts)

    partials = pl.pallas_call(
        kernel,
        out_shape=jax.ShapeDtypeStruct((N, num_tiles, 1, 128), jnp.float32),
        grid_spec=pltpu.PrefetchScalarGridSpec(
            num_scalar_prefetch=0,
            grid=(N, num_tiles),
            in_specs=[
                pl.BlockSpec((1, C, ls, 128), lambda n, j: (n, 0, j, 0)),  # logits
                pl.BlockSpec((1, ls, 128), lambda n, j: (n, j, 0)),        # targets
            ],
            out_specs=pl.BlockSpec((1, 1, 1, 128), lambda n, j: (n, j, 0, 0)),
        ),
        compiler_params=pltpu.CompilerParams(
            dimension_semantics=("parallel", "parallel"),
            vmem_limit_bytes=vmem_limit),
    )(x4, t3)

    total = jnp.sum(partials)                          # tiny final reduce in XLA
    if size_average:
        return total / (N * HW)
    return total


def _focal_loss_2d_pallas(x, target, *, gamma, alpha_consts, size_average,
                          block_rows=2048):
    M, C = x.shape
    itemsize = jnp.dtype(x.dtype).itemsize
    sub = max(8, 32 // itemsize)
    tm = max(sub, (min(block_rows, M) // sub) * sub)
    if tm >= M:
        tm = M                                         # full dim is always legal
    num_tiles = pl.cdiv(M, tm)

    t2 = jnp.asarray(target).reshape(M, 1).astype(jnp.int32)

    kernel = functools.partial(
        _focal_loss_2d_kernel, gamma=float(gamma), num_classes=C,
        alpha_consts=alpha_consts)

    loss = pl.pallas_call(
        kernel,
        out_shape=jax.ShapeDtypeStruct((M, 1), jnp.float32),
        grid_spec=pltpu.PrefetchScalarGridSpec(
            num_scalar_prefetch=0,
            grid=(num_tiles,),
            in_specs=[
                pl.BlockSpec((tm, C), lambda i: (i, 0)),
                pl.BlockSpec((tm, 1), lambda i: (i, 0)),
            ],
            out_specs=pl.BlockSpec((tm, 1), lambda i: (i, 0)),
        ),
        compiler_params=pltpu.CompilerParams(
            dimension_semantics=("parallel",),
            vmem_limit_bytes=32 << 20),
    )(x, t2)

    total = jnp.sum(loss)
    if size_average:
        return total / M
    return total


def focal_loss_pallas(logits, target, *, gamma=0.0, alpha=None, size_average=True,
                      block_bytes=4 << 20):
    """Focal loss matching PyTorch FocalLoss.forward semantics.

    logits: (N, C, *spatial) or (M, C); target: integer class indices.
    Returns a scalar (mean or sum over all positions).
    """
    x = jnp.asarray(logits)
    C = x.shape[1]
    alpha_consts = _alpha_constants(alpha, C)
    if x.ndim > 2:
        return _focal_loss_nd_pallas(x, target, gamma=gamma,
                                     alpha_consts=alpha_consts,
                                     size_average=size_average,
                                     block_bytes=block_bytes)
    return _focal_loss_2d_pallas(x, target, gamma=gamma,
                                 alpha_consts=alpha_consts,
                                 size_average=size_average)


# --------------------------------------------------------------------------
# Pure-JAX reference mirroring the PyTorch forward.
# --------------------------------------------------------------------------
def _focal_loss_ref(logits, target, *, gamma=0.0, alpha=None, size_average=True):
    x = jnp.asarray(logits)
    if x.ndim > 2:
        n, c = x.shape[0], x.shape[1]
        x = jnp.transpose(x.reshape(n, c, -1), (0, 2, 1)).reshape(-1, c)
    x = x.astype(jnp.float32)
    t = jnp.asarray(target).reshape(-1)
    logp = jax.nn.log_softmax(x, axis=1)
    logpt = jnp.take_along_axis(logp, t[:, None], axis=1)[:, 0]
    pt = jnp.exp(logpt)
    if alpha is not None:
        if isinstance(alpha, (float, int)):
            a = jnp.array([alpha, 1.0 - alpha], jnp.float32)
        else:
            a = jnp.asarray(alpha, jnp.float32)
        logpt = logpt * a[t]
    loss = -1.0 * (1.0 - pt) ** gamma * logpt
    return loss.mean() if size_average else loss.sum()


if __name__ == "__main__":
    key = jax.random.PRNGKey(0)
    ks = jax.random.split(key, 6)

    # --- 4D segmentation-style input (HW 128-aligned: no pad, no mask) ---
    N, C, H, W = 2, 4, 16, 16
    logits = jax.random.normal(ks[0], (N, C, H, W), jnp.float32)
    target = jax.random.randint(ks[1], (N, H, W), 0, C, jnp.int32)

    gamma = 2.0
    alpha = [0.25, 0.5, 0.75, 1.0]

    out = jax.block_until_ready(
        focal_loss_pallas(logits, target, gamma=gamma, alpha=alpha,
                          size_average=True))
    ref = _focal_loss_ref(logits, target, gamma=gamma, alpha=alpha,
                          size_average=True)
    assert jnp.allclose(out, ref, rtol=1e-4, atol=1e-5), (out, ref)

    # gamma=0 / alpha=None / sum-reduction path
    out2 = jax.block_until_ready(
        focal_loss_pallas(logits, target, gamma=0.0, alpha=None,
                          size_average=False))
    ref2 = _focal_loss_ref(logits, target, gamma=0.0, alpha=None,
                           size_average=False)
    assert jnp.allclose(out2, ref2, rtol=1e-4, atol=1e-5), (out2, ref2)

    # non-integer gamma (generic pow fallback), mean reduction
    out3 = jax.block_until_ready(
        focal_loss_pallas(logits, target, gamma=1.5, alpha=None,
                          size_average=True))
    ref3 = _focal_loss_ref(logits, target, gamma=1.5, alpha=None,
                           size_average=True)
    assert jnp.allclose(out3, ref3, rtol=1e-4, atol=1e-5), (out3, ref3)

    # non-128-aligned spatial extent (exercises the last-tile mask path)
    H2 = W2 = 9
    logits4 = jax.random.normal(ks[2], (N, C, H2, W2), jnp.float32)
    target4 = jax.random.randint(ks[3], (N, H2, W2), 0, C, jnp.int32)
    out4 = jax.block_until_ready(
        focal_loss_pallas(logits4, target4, gamma=2.0, alpha=alpha,
                          size_average=True))
    ref4 = _focal_loss_ref(logits4, target4, gamma=2.0, alpha=alpha,
                           size_average=True)
    assert jnp.allclose(out4, ref4, rtol=1e-4, atol=1e-5), (out4, ref4)

    # 2D classification path (lane-axis-C kernel, no HBM transpose), ragged rows
    M, C2 = 77, 6
    logits5 = jax.random.normal(ks[4], (M, C2), jnp.float32)
    target5 = jax.random.randint(ks[5], (M,), 0, C2, jnp.int32)
    alpha5 = [0.1, 0.2, 0.3, 0.4, 0.5, 0.6]
    out5 = jax.block_until_ready(
        focal_loss_pallas(logits5, target5, gamma=2.0, alpha=alpha5,
                          size_average=True))
    ref5 = _focal_loss_ref(logits5, target5, gamma=2.0, alpha=alpha5,
                           size_average=True)
    assert jnp.allclose(out5, ref5, rtol=1e-4, atol=1e-5), (out5, ref5)

    print("KERNEL_OK")
</pallas_src>

<mosaic_0001>
module attributes {stable_mosaic.version = 11 : i64} {
  func.func @_focal_loss_nd_kernel(%arg0: i32, %arg1: i32, %arg2: memref<1x4x2x128xf32, #tpu.memory_space<vmem>>, %arg3: memref<1x2x128xi32, #tpu.memory_space<vmem>>, %arg4: memref<1x1x1x128xf32, #tpu.memory_space<vmem>>) attributes {dimension_semantics = [#tpu.dimension_semantics<parallel>, #tpu.dimension_semantics<parallel>], iteration_bounds = array<i64: 2, 1>, scalar_prefetch = 0 : i64, scratch_operands = 0 : i64, tpu.core_type = #tpu.core_type<tc>, window_params = [{transform_indices = @transform_0, window_bounds = array<i64: 1, 4, 2, 128>}, {transform_indices = @transform_1, window_bounds = array<i64: 1, 2, 128>}, {transform_indices = @transform_2, window_bounds = array<i64: 1, 1, 1, 128>}]} {
    %c0 = arith.constant 0 : index
    %c0_0 = arith.constant 0 : index
    %c0_1 = arith.constant 0 : index
    %0 = vector.load %arg3[%c0, %c0_0, %c0_1] : memref<1x2x128xi32, #tpu.memory_space<vmem>>, vector<1x2x128xi32>
    %1 = vector.shape_cast %0 : vector<1x2x128xi32> to vector<2x128xi32>
    %c0_2 = arith.constant 0 : index
    %c0_3 = arith.constant 0 : index
    %c0_4 = arith.constant 0 : index
    %c0_5 = arith.constant 0 : index
    %2 = vector.load %arg2[%c0_2, %c0_3, %c0_4, %c0_5] : memref<1x4x2x128xf32, #tpu.memory_space<vmem>>, vector<1x1x2x128xf32>
    %3 = vector.shape_cast %2 : vector<1x1x2x128xf32> to vector<2x128xf32>
    %c0_6 = arith.constant 0 : index
    %c1 = arith.constant 1 : index
    %c0_7 = arith.constant 0 : index
    %c0_8 = arith.constant 0 : index
    %4 = vector.load %arg2[%c0_6, %c1, %c0_7, %c0_8] : memref<1x4x2x128xf32, #tpu.memory_space<vmem>>, vector<1x1x2x128xf32>
    %5 = vector.shape_cast %4 : vector<1x1x2x128xf32> to vector<2x128xf32>
    %6 = arith.maximumf %3, %5 : vector<2x128xf32>
    %c0_9 = arith.constant 0 : index
    %c2 = arith.constant 2 : index
    %c0_10 = arith.constant 0 : index
    %c0_11 = arith.constant 0 : index
    %7 = vector.load %arg2[%c0_9, %c2, %c0_10, %c0_11] : memref<1x4x2x128xf32, #tpu.memory_space<vmem>>, vector<1x1x2x128xf32>
    %8 = vector.shape_cast %7 : vector<1x1x2x128xf32> to vector<2x128xf32>
    %9 = arith.maximumf %6, %8 : vector<2x128xf32>
    %c0_12 = arith.constant 0 : index
    %c3 = arith.constant 3 : index
    %c0_13 = arith.constant 0 : index
    %c0_14 = arith.constant 0 : index
    %10 = vector.load %arg2[%c0_12, %c3, %c0_13, %c0_14] : memref<1x4x2x128xf32, #tpu.memory_space<vmem>>, vector<1x1x2x128xf32>
    %11 = vector.shape_cast %10 : vector<1x1x2x128xf32> to vector<2x128xf32>
    %12 = arith.maximumf %9, %11 : vector<2x128xf32>
    %c0_15 = arith.constant 0 : index
    %c0_16 = arith.constant 0 : index
    %c0_17 = arith.constant 0 : index
    %c0_18 = arith.constant 0 : index
    %13 = vector.load %arg2[%c0_15, %c0_16, %c0_17, %c0_18] : memref<1x4x2x128xf32, #tpu.memory_space<vmem>>, vector<1x1x2x128xf32>
    %14 = vector.shape_cast %13 : vector<1x1x2x128xf32> to vector<2x128xf32>
    %15 = arith.subf %14, %12 : vector<2x128xf32>
    %16 = math.exp %15 : vector<2x128xf32>
    %c0_i32 = arith.constant 0 : i32
    %17 = vector.broadcast %c0_i32 : i32 to vector<2x128xi32>
    %18 = arith.cmpi eq, %1, %17 : vector<2x128xi32>
    %cst = arith.constant 0.000000e+00 : f32
    %19 = vector.broadcast %cst : f32 to vector<2x128xf32>
    %20 = arith.select %18, %15, %19 : vector<2x128xi1>, vector<2x128xf32>
    %cst_19 = arith.constant 2.500000e-01 : f32
    %cst_20 = arith.constant 0.000000e+00 : f32
    %21 = vector.broadcast %cst_19 : f32 to vector<2x128xf32>
    %22 = vector.broadcast %cst_20 : f32 to vector<2x128xf32>
    %23 = arith.select %18, %21, %22 : vector<2x128xi1>, vector<2x128xf32>
    %c0_21 = arith.constant 0 : index
    %c1_22 = arith.constant 1 : index
    %c0_23 = arith.constant 0 : index
    %c0_24 = arith.constant 0 : index
    %24 = vector.load %arg2[%c0_21, %c1_22, %c0_23, %c0_24] : memref<1x4x2x128xf32, #tpu.memory_space<vmem>>, vector<1x1x2x128xf32>
    %25 = vector.shape_cast %24 : vector<1x1x2x128xf32> to vector<2x128xf32>
    %26 = arith.subf %25, %12 : vector<2x128xf32>
    %27 = math.exp %26 : vector<2x128xf32>
    %c1_i32 = arith.constant 1 : i32
    %28 = vector.broadcast %c1_i32 : i32 to vector<2x128xi32>
    %29 = arith.cmpi eq, %1, %28 : vector<2x128xi32>
    %30 = arith.addf %16, %27 : vector<2x128xf32>
    %31 = arith.select %29, %26, %20 : vector<2x128xi1>, vector<2x128xf32>
    %cst_25 = arith.constant 5.000000e-01 : f32
    %32 = vector.broadcast %cst_25 : f32 to vector<2x128xf32>
    %33 = arith.select %29, %32, %23 : vector<2x128xi1>, vector<2x128xf32>
    %c0_26 = arith.constant 0 : index
    %c2_27 = arith.constant 2 : index
    %c0_28 = arith.constant 0 : index
    %c0_29 = arith.constant 0 : index
    %34 = vector.load %arg2[%c0_26, %c2_27, %c0_28, %c0_29] : memref<1x4x2x128xf32, #tpu.memory_space<vmem>>, vector<1x1x2x128xf32>
    %35 = vector.shape_cast %34 : vector<1x1x2x128xf32> to vector<2x128xf32>
    %36 = arith.subf %35, %12 : vector<2x128xf32>
    %37 = math.exp %36 : vector<2x128xf32>
    %c2_i32 = arith.constant 2 : i32
    %38 = vector.broadcast %c2_i32 : i32 to vector<2x128xi32>
    %39 = arith.cmpi eq, %1, %38 : vector<2x128xi32>
    %40 = arith.addf %30, %37 : vector<2x128xf32>
    %41 = arith.select %39, %36, %31 : vector<2x128xi1>, vector<2x128xf32>
    %cst_30 = arith.constant 7.500000e-01 : f32
    %42 = vector.broadcast %cst_30 : f32 to vector<2x128xf32>
    %43 = arith.select %39, %42, %33 : vector<2x128xi1>, vector<2x128xf32>
    %c0_31 = arith.constant 0 : index
    %c3_32 = arith.constant 3 : index
    %c0_33 = arith.constant 0 : index
    %c0_34 = arith.constant 0 : index
    %44 = vector.load %arg2[%c0_31, %c3_32, %c0_33, %c0_34] : memref<1x4x2x128xf32, #tpu.memory_space<vmem>>, vector<1x1x2x128xf32>
    %45 = vector.shape_cast %44 : vector<1x1x2x128xf32> to vector<2x128xf32>
    %46 = arith.subf %45, %12 : vector<2x128xf32>
    %47 = math.exp %46 : vector<2x128xf32>
    %c3_i32 = arith.constant 3 : i32
    %48 = vector.broadcast %c3_i32 : i32 to vector<2x128xi32>
    %49 = arith.cmpi eq, %1, %48 : vector<2x128xi32>
    %50 = arith.addf %40, %47 : vector<2x128xf32>
    %51 = arith.select %49, %46, %41 : vector<2x128xi1>, vector<2x128xf32>
    %cst_35 = arith.constant 1.000000e+00 : f32
    %52 = vector.broadcast %cst_35 : f32 to vector<2x128xf32>
    %53 = arith.select %49, %52, %43 : vector<2x128xi1>, vector<2x128xf32>
    %54 = math.log %50 : vector<2x128xf32>
    %55 = arith.subf %51, %54 : vector<2x128xf32>
    %56 = arith.mulf %55, %53 : vector<2x128xf32>
    %57 = math.exp %55 : vector<2x128xf32>
    %cst_36 = arith.constant 1.000000e+00 : f32
    %58 = vector.broadcast %cst_36 : f32 to vector<2x128xf32>
    %59 = arith.subf %58, %57 : vector<2x128xf32>
    %60 = arith.mulf %59, %59 : vector<2x128xf32>
    %61 = arith.mulf %60, %56 : vector<2x128xf32>
    %cst_37 = arith.constant 0.000000e+00 : f32
    %62 = vector.broadcast %cst_37 : f32 to vector<2x128xf32>
    %63 = arith.subf %62, %61 : vector<2x128xf32>
    %cst_38 = arith.constant dense<0.000000e+00> : vector<128xf32>
    %64 = vector.multi_reduction <add>, %63, %cst_38 [0] : vector<2x128xf32> to vector<128xf32>
    %65 = vector.shape_cast %64 : vector<128xf32> to vector<1x128xf32>
    %66 = vector.shape_cast %65 : vector<1x128xf32> to vector<1x1x1x128xf32>
    %c0_39 = arith.constant 0 : index
    %c0_40 = arith.constant 0 : index
    %c0_41 = arith.constant 0 : index
    %c0_42 = arith.constant 0 : index
    %67 = vector.load %arg4[%c0_39, %c0_40, %c0_41, %c0_42] : memref<1x1x1x128xf32, #tpu.memory_space<vmem>>, vector<1x1x1x128xf32>
    tpu.vector_store %arg4[%c0_39, %c0_40, %c0_41, %c0_42], %66 {strides = array<i32>} : memref<1x1x1x128xf32, #tpu.memory_space<vmem>>, vector<1x1x1x128xf32>,
    return
  }
  func.func @transform_0(%arg0: i32, %arg1: i32) -> (i32, i32, i32, i32) {
    %c0_i32 = arith.constant 0 : i32
    %c0_i32_0 = arith.constant 0 : i32
    %c0_i32_1 = arith.constant 0 : i32
    return %arg0, %c0_i32, %arg1, %c0_i32_0 : i32, i32, i32, i32
  }
  func.func @transform_1(%arg0: i32, %arg1: i32) -> (i32, i32, i32) {
    %c0_i32 = arith.constant 0 : i32
    %c0_i32_0 = arith.constant 0 : i32
    return %arg0, %arg1, %c0_i32 : i32, i32, i32
  }
  func.func @transform_2(%arg0: i32, %arg1: i32) -> (i32, i32, i32, i32) {
    %c0_i32 = arith.constant 0 : i32
    %c0_i32_0 = arith.constant 0 : i32
    %c0_i32_1 = arith.constant 0 : i32
    return %arg0, %arg1, %c0_i32, %c0_i32_0 : i32, i32, i32, i32
  }
}

</mosaic_0001>

<bundles_post_ra>
// kernel: tpu_custom_call.1
= control target key start
LH: loop header
LB: loop body
LE: loop exit
PB: predicated region body
PF: predicated region fallthrough
CT: control target
= control target key end

     0   :  { %7 = vsyncpa [#allocation3], 0  ;;  %s876_s0 = inlined_call_operand.hbm [shape: f32[2,4,2,128], index: 0, kind: input, shape index: {}]   ;;  %s877_s1 = inlined_call_operand.hbm [shape: s32[2,2,128], index: 1, kind: input, shape index: {}]   ;;  %s878_s2 = inlined_call_operand.hbm [shape: f32[2,1,1,128], index: 2, kind: output, shape index: {}]  }
   0x1   :  { %9 = vsyncpa [#allocation3 + $0x1], 0 }
   0x2   :  { %10 = vsyncpa [#allocation6], 0 }
   0x3   :  { %12 = vsyncpa [#allocation6 + $0x1], 0 }
   0x4   :  { %13 = vsyncpa [#allocation4], 0 }
   0x5   :  { %15 = vsyncpa [#allocation4 + $0x1], 0  ;;  %s660_s9 = smov 0   ;;  %s662_s10 = smov 0  }
   0x6   :  { %s664_s11 = smov 0   ;;  %s666_s12 = smov 0  }
   0x7   :  { %s668_s13 = smov 0   ;;  %s670_s14 = smov 0  }
   0x8 LB: > { %s390_s15 = sadd.s32 4294967295, %s637_s14   ;;  %s391_s16 = sadd.s32 4294967294, %s637_s14   ;;  %s637_s14 = sphi %s670_s14, %s21_s14   ;;  %s633_s13 = sphi %s668_s13, %s897_s13   ;;  %s629_s12 = sphi %s666_s12, %s896_s12   ;;  %s625_s11 = sphi %s664_s11, %s895_s11   ;;  %s621_s10 = sphi %s662_s10, %s894_s10   ;;  %s617_s9 = sphi %s660_s9, %s893_s9  }
   0x9   : > { %s33_s17 = sadd.s32 1, %s633_s13  ;;  %s42_s18 = sadd.s32 1, %s625_s11 }
   0xa   : > { %p35_p0 = scmp.ge.s32.totalorder %s33_s17, 2  ;;  %p49_p1 = scmp.ne.s32.totalorder %s625_s11, %s621_s10 }
   0xb   : > { %p50_p2 = scmp.eq.s32.totalorder %s637_s14, 0  ;;  %p55_p3 = scmp.ne.s32.totalorder %s621_s10, %s617_s9 }
   0xc   : > { %s899_s17 = smov (%p35_p0, %s33_s17), 0  ;;  %p56_p5 = scmp.eq.s32.totalorder %s390_s15, 0 }
   0xd   : > { %p701_p4 = por %p50_p2, %p49_p1  ;;  %s37_s20 = ssub.s32 %s633_s13, %s899_s17 }
   0xe   : > { %p109_p6 = scmp.eq.s32.totalorder %s390_s15, 1  ;;  %p40_p7 = scmp.eq.s32.totalorder %s37_s20, 0 }
   0xf   : > { %p707_p8 = por %p56_p5, %p55_p3  ;;  %p115_p10 = scmp.eq.s32.totalorder %s391_s16, 1 }
  0x10   : > { %p711_p9 = por %p109_p6, %p49_p1  ;;  %p426_p13 = scmp.lt.s32.totalorder %s637_s14, 2 }
  0x11   : > { %s882_s21 = scalar_select %p707_p8, 1, 0 }
  0x12   : > { %s883_s22 = scalar_select %p711_p9, 1, 0 }
  0x13   : > { %s716_s23 = scalar_select %p40_p7, %s625_s11, %s42_s18  }
  0x14   : > { %p718_p11 = por %p115_p10, %p55_p3  ;;  %s725_s25 = sand.u32 1, %s625_s11  }
  0x15   : > { %s394_s26 = sshll.u32 %s725_s25, 3  ;;  %s408_s27 = sshll.u32 %s633_s13, 7 }
  0x16   : > { %s884_s24 = scalar_select %p718_p11, 1, 0 }
  0x17   : > { %s732_s30 = scalar_lea.hbm %s876_s0, %s408_s27  ;;  %s139_s3 = scalar_lea.vmem [#allocation2], %s394_s26 }
  0x18   : > { %s147_s4 = sshll.u32 %s139_s3, 4  ;;  %p738_p0 = pnand %p426_p13, %p701_p4  ;;  %s734_s4 = int_to_ptr.vmem [resolvable:$true] %s147_s4 }
  0x19   : > { %s136_s6 = scalar_lea.sflag [#allocation3], %s725_s25  ;;  %s491_s7 = scalar_lea.hbm %s732_s30, 128 }
  0x1a   : > { %p492_p2 = scmp.ne.s32.totalorder %s732_s30, %s491_s7  ;;  %p493_p3 = pneg %p738_p0 }
  0x1b   : > { %s496_s16 = scalar_lea.hbm %s876_s0, 256  ;;  %p497_p4 = scmp.lt.u32.totalorder %s732_s30, %s876_s0 }
  0x1c   : > { %p494_p5 = pnand %p493_p3, %p492_p2  ;;  %p498_p7 = scmp.lt.u32.totalorder %s496_s16, %s491_s7 }
  0x1d   : > { %p500_p13 = scmp.lt.u32.totalorder %s491_s7, %s732_s30 }
  0x1e   : > { %p495_p6 = pneg %p494_p5  ;;  %p499_p10 = por %p498_p7, %p497_p4 }
  0x20   : > { %p501_p12 = por %p500_p13, %p499_p10 }
  0x22   : > { %p502_p1 = pnand %p501_p12, %p495_p6 }
  0x24   : > { %505 = shalt.err (!%p502_p1)
}
  0x25   : > { %s506_s20 = scalar_lea.vmem %s734_s4, 128  ;;  %s639_s26 = smov [#allocation2]  }
  0x26   : > { %p507_p2 = scmp.ne.s32.totalorder %s734_s4, %s506_s20  ;;  %s511_s27 = sshll.u32 %s639_s26, 4  ;;  %s512_s27 = int_to_ptr.vmem [resolvable:$false] %s511_s27 }
  0x27   : > { %s513_s28 = scalar_lea.vmem %s512_s27, 256  ;;  %p514_p9 = scmp.lt.s32.totalorder %s734_s4, %s512_s27 }
  0x28   : > { %p509_p5 = pnand %p507_p2, %p493_p3  ;;  %p515_p4 = scmp.lt.s32.totalorder %s513_s28, %s506_s20 }
  0x2a   : > { %p510_p11 = pneg %p509_p5  ;;  %p516_p7 = por %p515_p4, %p514_p9 }
  0x2c   : > { %p517_p10 = pnand %p516_p7, %p510_p11 }
  0x2e   : > { %520 = shalt.err (!%p517_p10)
}
  0x2f   : > { %s640_s29 = smov 32   ;;  %s641_s3 = smov 2  }
  0x30   : > { %418 = dma.hbm_to_vmem [thread:$0]  (!%p738_p0), %s732_s30, 128, %s734_s4, %s136_s6, %s640_s29, %s640_s29, %s641_s3  }
  0x31   : > { %p174_p12 = scmp.lt.s32.totalorder %s637_s14, 3  ;;  %s397_s7 = sshll.u32 %s725_s25, 1 }
  0x32   : > { %s398_s8 = sshll.u32 %s633_s13, 5  ;;  %p886_p9 = scmp.ge.s32.totalorder %s637_s14, 1 }
  0x33   : > { %s783_s19 = scalar_lea.hbm %s877_s1, %s398_s8  ;;  %s161_s20 = scalar_lea.vmem [#allocation5], %s397_s7 }
  0x34   : > { %p776_p11 = pnand %p886_p9, %p174_p12  ;;  %s169_s26 = sshll.u32 %s161_s20, 4  ;;  %s170_s26 = int_to_ptr.vmem [resolvable:$true] %s169_s26 }
  0x35   : > { %s158_s30 = scalar_lea.sflag [#allocation6], %s725_s25  ;;  %s521_s4 = scalar_lea.hbm %s783_s19, 32 }
  0x36   : > { %s887_s15 = scalar_select %p776_p11, 1, 0 }
  0x37   : > { %p522_p1 = scmp.ne.s32.totalorder %s783_s19, %s521_s4  ;;  %s526_s28 = scalar_lea.hbm %s877_s1, 64 }
  0x38   : > { %p527_p2 = scmp.lt.u32.totalorder %s783_s19, %s877_s1  ;;  %p528_p5 = scmp.lt.u32.totalorder %s526_s28, %s521_s4 }
  0x39   : > { %p524_p6 = pnand %p522_p1, %p493_p3  ;;  %p530_p7 = scmp.lt.u32.totalorder %s521_s4, %s783_s19 }
  0x3a   : > { %p529_p4 = por %p528_p5, %p527_p2 }
  0x3b   : > { %p525_p13 = pneg %p524_p6 }
  0x3c   : > { %p531_p10 = por %p530_p7, %p529_p4 }
  0x3e   : > { %p532_p12 = pnand %p531_p10, %p525_p13 }
  0x40   : > { %535 = shalt.err (!%p532_p12)
}
  0x41   : > { %s536_s25 = scalar_lea.vmem %s170_s26, 32  ;;  %s642_s7 = smov [#allocation5]  }
  0x42   : > { %p537_p9 = scmp.ne.s32.totalorder %s170_s26, %s536_s25  ;;  %s541_s8 = sshll.u32 %s642_s7, 4  ;;  %s542_s8 = int_to_ptr.vmem [resolvable:$false] %s541_s8 }
  0x43   : > { %s543_s16 = scalar_lea.vmem %s542_s8, 64  ;;  %p544_p8 = scmp.lt.s32.totalorder %s170_s26, %s542_s8 }
  0x44   : > { %p539_p1 = pnand %p537_p9, %p493_p3  ;;  %p545_p11 = scmp.lt.s32.totalorder %s543_s16, %s536_s25 }
  0x46   : > { %p540_p6 = pneg %p539_p1  ;;  %p546_p2 = por %p545_p11, %p544_p8 }
  0x48   : > { %p547_p5 = pnand %p546_p2, %p540_p6 }
  0x4a   : > { %550 = shalt.err (!%p547_p5)
}
  0x4b   : > { %421 = dma.hbm_to_vmem [thread:$0]  (!%p738_p0), %s783_s19, 32, %s170_s26, %s158_s30  }
  0x4c   : > { %p888_p13 = scmp.ne.s32.totalorder %s887_s15, 0 }
  0x4d   : > { %s808_s18 = sand.u32 (!%p888_p13), 1, %s621_s10   ;;  %p889_p3 = scmp.ne.s32.totalorder (!%p888_p13), %s882_s21, 0 }
  0x4e   : > { %178 = sbr.rel (%p888_p13) target bundleno = 181 (0xb5), region = 28  ;;  %s400_s20 = sshll.u32 (!%p888_p13), %s808_s18, 3 }
  0x4f   : > { %s181_s4 = scalar_lea.sflag (!%p888_p13), [#allocation3], %s808_s18  ;;  %s184_s6 = scalar_lea.vmem (!%p888_p13), [#allocation2], %s400_s20 }
  0x55   : > { %604 = dma.done.wait (%p889_p3), %s181_s4, 128  }
  0x56   : > { %606 = vsyncadd (%p889_p3), %s181_s4, 4294967168  ;;  %s401_s5 = sshll.u32 %s808_s18, 1  ;;  %s190_s15 = scalar_lea.sflag [#allocation6], %s808_s18 }
  0x57   : > { %s193_s19 = scalar_lea.vmem [#allocation5], %s401_s5 }
  0x58   : > { %608 = dma.done.wait (%p889_p3), %s190_s15, 32  }
  0x59   : > { %610 = vsyncadd (%p889_p3), %s190_s15, 4294967264  ;;  %v219_v0 = vld [vmem:[%s184_s6] sm:$0x3]  ;;  %v402_v1 = vld [vmem:[%s184_s6 + $0x2] sm:$0x3]  ;;  %v643_v31 = vmov 0.0  }
  0x5a   : > { %v222_v2 = vmax.f32 %v219_v0, %v402_v1  ;;  %v403_v3 = vld [vmem:[%s184_s6 + $0x4] sm:$0x3]  ;;  %v404_v4 = vld [vmem:[%s184_s6 + $0x6] sm:$0x3]  ;;  %v218_v20 = vld [vmem:[%s193_s19] sm:$0x3] }
  0x5b   : > { %vm232_vm0 = vcmp.eq.s32.totalorder %v218_v20, 0  ;;  %vm238_vm1 = vcmp.eq.s32.totalorder %v218_v20, 1  ;;  %vm245_vm2 = vcmp.eq.s32.totalorder %v218_v20, 2  ;;  %vm252_vm3 = vcmp.eq.s32.totalorder %v218_v20, 3  ;;  %s217_s21 = scalar_lea.vmem [#allocation7], %s808_s18  ;;  %s405_s30 = sshll.u32 %s629_s12, 4 }
  0x5c   : > { %v225_v5 = vmax.f32 %v222_v2, %v403_v3  ;;  %v234_v32 = vsel %vm232_vm0, 0.25, %v643_v31  ;;  %vm266_vm4 = vcmask 1041408   ;;  %s289_s26 = sshll.u32 %s217_s21, 4  ;;  %s829_s29 = scalar_lea.hbm %s878_s2, %s405_s30  ;;  %s824_s26 = int_to_ptr.vmem [resolvable:$true] %s289_s26 }
  0x5d   : > { %v241_v33 = vsel %vm238_vm1, 0.5, %v234_v32  ;;  %s276_s3 = scalar_lea.sflag [#allocation4], %s808_s18  ;;  %s551_s25 = scalar_lea.vmem %s824_s26, 16 }
  0x5e   : > { %v228_v6 = vmax.f32 %v225_v5, %v404_v4  ;;  %v248_v34 = vsel %vm245_vm2, 0.75, %v241_v33  ;;  %p552_p8 = scmp.ne.s32.totalorder %s824_s26, %s551_s25  ;;  %p890_p0 = scmp.ne.s32.totalorder %s883_s22, 0 }
  0x5f   : > { %v255_v35 = vsel %vm252_vm3, 1.0, %v248_v34  ;;  %s644_s12 = smov [#allocation7]  }
  0x60   : > { %v229_v7 = vsub.f32 %v219_v0, %v228_v6  ;;  %v235_v8 = vsub.f32 %v402_v1, %v228_v6  ;;  %v242_v9 = vsub.f32 %v403_v3, %v228_v6  ;;  %v249_v10 = vsub.f32 %v404_v4, %v228_v6  ;;  %p553_p11 = pnand %p552_p8, %p890_p0  ;;  %s555_s7 = sshll.u32 %s644_s12, 4  ;;  %s556_s7 = int_to_ptr.vmem [resolvable:$false] %s555_s7 }
  0x61   : > { %s557_s8 = scalar_lea.vmem %s556_s7, 32  ;;  %p558_p7 = scmp.lt.s32.totalorder %s824_s26, %s556_s7 }
  0x62   : > { %v230_v11 = vmul.f32 1.442695, %v229_v7  ;;  %v236_v12 = vmul.f32 1.442695, %v235_v8  ;;  %v243_v13 = vmul.f32 1.442695, %v242_v9  ;;  %p554_p4 = pneg %p553_p11  ;;  %p559_p10 = scmp.lt.s32.totalorder %s557_s8, %s551_s25 }
  0x63   : > { %v250_v14 = vmul.f32 1.442695, %v249_v10  ;;  %v233_v23 = vsel %vm232_vm0, %v229_v7, 0.0 }
  0x64   : > { %479 = vpow2.f32 %v230_v11  ;;  %v240_v24 = vsel %vm238_vm1, %v235_v8, %v233_v23  ;;  %p560_p12 = por %p559_p10, %p558_p7 }
  0x65   : > { %481 = vpow2.f32 %v236_v12  ;;  %v247_v25 = vsel %vm245_vm2, %v242_v9, %v240_v24 }
  0x66   : > { %483 = vpow2.f32 %v243_v13  ;;  %v254_v27 = vsel %vm252_vm3, %v249_v10, %v247_v25  ;;  %p561_p9 = pnand %p560_p12, %p554_p4 }
  0x67   : > { %485 = vpow2.f32 %v250_v14 }
  0x6e   : > { %v480_v15 = vpop.eup %479 }
  0x6f   : > { %v482_v16 = vpop.eup %481 }
  0x70   : > { %v484_v17 = vpop.eup %483  ;;  %v239_v18 = vadd.f32 %v482_v16, %v480_v15 }
  0x71   : > { %v486_v19 = vpop.eup %485 }
  0x72   : > { %v246_v21 = vadd.f32 %v484_v17, %v239_v18 }
  0x74   : > { %v253_v22 = vadd.f32 %v486_v19, %v246_v21 }
  0x76   : > { %487 = vlog2.f32 %v253_v22 }
  0x80   : > { %v488_v26 = vpop.eup %487 }
  0x81   : > { %v257_v28 = vmul.f32 0.6931472, %v488_v26 }
  0x83   : > { %v258_v29 = vsub.f32 %v254_v27, %v257_v28 }
  0x85   : > { %v260_v30 = vmul.f32 1.442695, %v258_v29  ;;  %v259_v37 = vmul.f32 %v258_v29, %v255_v35 }
  0x87   : > { %489 = vpow2.f32 %v260_v30 }
  0x91   : > { %v490_v36 = vpop.eup %489 }
  0x92   : > { %v262_v38 = vsub.f32 1.0, %v490_v36 }
  0x94   : > { %v263_v39 = vmul.f32 %v262_v38, %v262_v38 }
  0x96   : > { %v264_v40 = vmul.f32 %v263_v39, %v259_v37 }
  0x98   : > { %v265_v41 = vsub.f32 0.0, %v264_v40 }
  0x9a   : > { %v267_v42 = vsel %vm266_vm4, %v265_v41, 0.0 }
  0x9b   : > { %v268_v43 = vrot.slane %v267_v42, 4 }
  0x9d   : > { %v269_v44 = vadd.f32 %v268_v43, %v267_v42 }
  0x9f   : > { %v270_v45 = vrot.slane %v269_v44, 2 }
  0xa1   : > { %v271_v46 = vadd.f32 %v270_v45, %v269_v44 }
  0xa3   : > { %v272_v47 = vrot.slane %v271_v46, 1 }
  0xa5   : > { %v273_v48 = vadd.f32 %v272_v47, %v271_v46 }
  0xa7   : > { %274 = vst [vmem:[%s217_s21] sm:$0x1] %v273_v48 }
  0xa8   : > { %564 = shalt.err (!%p561_p9)
}
  0xa9   : > { %s565_s16 = scalar_lea.hbm %s829_s29, 16  ;;  %s569_s4 = scalar_lea.hbm %s878_s2, 32 }
  0xaa   : > { %p566_p1 = scmp.ne.s32.totalorder %s829_s29, %s565_s16  ;;  %p570_p5 = scmp.lt.u32.totalorder %s829_s29, %s878_s2 }
  0xab   : > { %p571_p13 = scmp.lt.u32.totalorder %s569_s4, %s565_s16  ;;  %p573_p8 = scmp.lt.u32.totalorder %s565_s16, %s829_s29 }
  0xac   : > { %p567_p6 = pnand %p566_p1, %p890_p0 }
  0xad   : > { %p572_p3 = por %p571_p13, %p570_p5 }
  0xae   : > { %p568_p2 = pneg %p567_p6 }
  0xaf   : > { %p574_p11 = por %p573_p8, %p572_p3 }
  0xb1   : > { %p575_p4 = pnand %p574_p11, %p568_p2 }
  0xb3   : > { %578 = shalt.err (!%p575_p4)
}
  0xb4   : > { %413 = dma.vmem_to_hbm [thread:$0]  (%p890_p0), %s824_s26, 16, %s829_s29, %s276_s3  }
  0xb5 PF: > { %s301_s15 = sand.u32 1, %s617_s9   ;;  %p891_p7 = scmp.ne.s32.totalorder %s884_s24, 0 }
  0xb6   : > { %p892_p10 = scmp.ge.s32.totalorder %s637_s14, 2  ;;  %s302_s19 = scalar_lea.sflag [#allocation4], %s301_s15 }
  0xb8   : > { %p423_p12 = pnand %p892_p10, %p891_p7 }
  0xba   : > { %612 = dma.done.wait (!%p423_p12), %s302_s19, 16  }
  0xbb   : > { %614 = vsyncadd (!%p423_p12), %s302_s19, 4294967280  ;;  %s21_s14 = sadd.s32 1, %s637_s14   ;;  %s893_s9 = smov %s621_s10 }
  0xbc   : > { %p18_p9 = scmp.ge.s32.totalorder %s21_s14, 4   ;;  %s894_s10 = smov %s625_s11 }
  0xbd   : > { %s895_s11 = smov %s716_s23  ;;  %s896_s12 = smov %s633_s13 }
  0xbe   : > { %s897_s13 = smov %s899_s17  ;;  %20 = sbr.rel (!%p18_p9) target bundleno = 8 (0x8), region = 89 }
  0xc5   :  { %306 = vsyncpa [#allocation3], 1 }
  0xc6   :  { %308 = vsyncpa [#allocation3 + $0x1], 1 }
  0xc7   :  { %309 = vsyncpa [#allocation6], 1 }
  0xc8   :  { %311 = vsyncpa [#allocation6 + $0x1], 1 }
  0xc9   :  { %312 = vsyncpa [#allocation4], 1 }
  0xca   :  { %314 = vsyncpa [#allocation4 + $0x1], 1 }

</bundles_post_ra>
